<compile_context>
chip_gen: v6e
topology: v6e:2x2x1
jax: 0.10.0
libtpu: 0.0.40
codegen_flags: <defaults>
</compile_context>

<pallas_src>
import jax
import jax.numpy as jnp
from jax.experimental import pallas as pl
from jax.experimental.pallas import tpu as pltpu

LANES = 128
_MIB = 1024 * 1024


def _l2loss_kernel(x_ref, o_ref):
    # Widen to f32 for the square: VPU has ~9x slack in an HBM-bound kernel, so
    # this is free, and it avoids bf16/fp8 precision loss / int8 overflow.
    xf = x_ref[...].astype(jnp.float32)
    o_ref[...] = (xf * xf * 0.5).astype(o_ref.dtype)


def _sublane_multiple(dtype) -> int:
    itemsize = jnp.dtype(dtype).itemsize
    if itemsize >= 4:
        return 8
    if itemsize == 2:
        return 16
    return 32


def _vmem_capacity_bytes() -> int:
    try:
        return int(pltpu.get_tpu_info().vmem_capacity_bytes)
    except Exception:
        # Conservative (v7x-sized) fallback if the query is unavailable.
        return 64 * _MIB


def _l2_loss_2d(x2d: jax.Array, *, block_bytes) -> jax.Array:
    """Run the elementwise kernel over a lane-dense (rows, 128) slab."""
    rows, _ = x2d.shape
    dtype = x2d.dtype
    itemsize = jnp.dtype(dtype).itemsize
    sub = _sublane_multiple(dtype)

    vmem_cap = _vmem_capacity_bytes()
    if block_bytes is None:
        # Byte budget, not row count: ~8 MiB blocks on 128-MiB-VMEM parts
        # (v5e/v6e), ~4 MiB on 64-MiB-VMEM v7x.
        block_bytes = 8 * _MIB if vmem_cap >= 128 * _MIB else 4 * _MIB

    # Row tile: byte budget / lane-row bytes, rounded DOWN to the sublane
    # quantum (never below it), then clamped to the (sub-rounded) row count.
    rows_rounded = ((rows + sub - 1) // sub) * sub
    tr_budget = max(sub, (block_bytes // (LANES * itemsize)) // sub * sub)
    tr = min(tr_budget, rows_rounded)
    grid = (pl.cdiv(rows, tr),)

    # Double-buffered input + output blocks plus headroom; generation-aware
    # clamp (leave compiler scratch headroom on v7x's 64 MiB VMEM).
    blk_bytes = tr * LANES * itemsize
    vmem_cap_clamp = 100 * _MIB if vmem_cap >= 128 * _MIB else 48 * _MIB
    vmem_limit = int(min(vmem_cap_clamp, max(16 * _MIB, 4 * blk_bytes + 4 * _MIB)))

    n = rows * LANES
    # TODO(synk): on v7x confirm via xprof that the single "parallel" axis is
    # megacore-sharded across both TensorCores; if not, split rows with a
    # leading size-2 CORE_PARALLEL axis.
    return pl.pallas_call(
        _l2loss_kernel,
        out_shape=jax.ShapeDtypeStruct((rows, LANES), dtype),
        grid_spec=pltpu.PrefetchScalarGridSpec(
            num_scalar_prefetch=0,
            grid=grid,
            in_specs=[pl.BlockSpec((tr, LANES), lambda i: (i, 0))],
            out_specs=pl.BlockSpec((tr, LANES), lambda i: (i, 0)),
        ),
        compiler_params=pltpu.CompilerParams(
            dimension_semantics=("parallel",),
            vmem_limit_bytes=vmem_limit,
        ),
        cost_estimate=pl.CostEstimate(
            flops=2 * n,
            transcendentals=0,
            bytes_accessed=2 * n * itemsize,
        ),
    )(x2d)


def l2_loss(x: jax.Array, *, block_bytes: int | None = None) -> jax.Array:
    """Pallas TPU implementation of L2Loss.forward: 0.5 * x**2 (elementwise)."""
    orig_shape = x.shape
    n = x.size
    if n == 0:
        return x

    flat = x.reshape(-1)
    n_aligned = (n // LANES) * LANES

    if n_aligned == n:
        # Fully lane-aligned: zero-copy reshape to (rows, 128), one HBM pass each way.
        out2d = _l2_loss_2d(flat.reshape(n // LANES, LANES), block_bytes=block_bytes)
        return out2d.reshape(orig_shape)

    if n_aligned == 0:
        # Tensor smaller than one lane row: not worth a kernel launch.
        xf = flat.astype(jnp.float32)
        return (xf * xf * 0.5).astype(x.dtype).reshape(orig_shape)

    # Ragged path: kernel over the 128-aligned prefix (zero-copy reshape), tiny
    # tail (<128 elems) in plain jnp. One concat pass instead of whole-array
    # pad + slice (two extra full HBM passes).
    head = _l2_loss_2d(
        flat[:n_aligned].reshape(n_aligned // LANES, LANES),
        block_bytes=block_bytes,
    ).reshape(-1)
    tail_f = flat[n_aligned:].astype(jnp.float32)
    tail = (tail_f * tail_f * 0.5).astype(x.dtype)
    return jnp.concatenate([head, tail]).reshape(orig_shape)


if __name__ == "__main__":
    key = jax.random.PRNGKey(0)
    # Shape consistent with a conv-net activation: NCHW = (2, 4, 16, 16)
    x = jax.random.normal(key, (2, 4, 16, 16), dtype=jnp.float32)

    out = l2_loss(x)
    jax.block_until_ready(out)

    ref = 0.5 * x ** 2
    assert out.shape == x.shape and out.dtype == x.dtype
    assert jnp.allclose(out, ref, atol=1e-6, rtol=1e-6)

    # Also exercise a ragged (n % 128 != 0) path once for correctness.
    x2 = jax.random.normal(jax.random.PRNGKey(1), (3, 5, 7), dtype=jnp.float32)
    out2 = l2_loss(x2)
    jax.block_until_ready(out2)
    assert jnp.allclose(out2, 0.5 * x2 ** 2, atol=1e-6, rtol=1e-6)

    print("KERNEL_OK")
</pallas_src>

<mosaic_0001>
module attributes {stable_mosaic.version = 11 : i64} {
  func.func @_l2loss_kernel(%arg0: i32, %arg1: memref<16x128xf32, #tpu.memory_space<vmem>>, %arg2: memref<16x128xf32, #tpu.memory_space<vmem>>) attributes {dimension_semantics = [#tpu.dimension_semantics<parallel>], iteration_bounds = array<i64: 1>, scalar_prefetch = 0 : i64, scratch_operands = 0 : i64, tpu.core_type = #tpu.core_type<tc>, window_params = [{transform_indices = @transform_0, window_bounds = array<i64: 16, 128>}, {transform_indices = @transform_1, window_bounds = array<i64: 16, 128>}]} {
    %c0 = arith.constant 0 : index
    %c0_0 = arith.constant 0 : index
    %0 = vector.load %arg1[%c0, %c0_0] : memref<16x128xf32, #tpu.memory_space<vmem>>, vector<16x128xf32>
    %1 = arith.mulf %0, %0 : vector<16x128xf32>
    %cst = arith.constant 5.000000e-01 : f32
    %2 = vector.broadcast %cst : f32 to vector<16x128xf32>
    %3 = arith.mulf %1, %2 : vector<16x128xf32>
    %c0_1 = arith.constant 0 : index
    %c0_2 = arith.constant 0 : index
    %4 = vector.load %arg2[%c0_1, %c0_2] : memref<16x128xf32, #tpu.memory_space<vmem>>, vector<16x128xf32>
    tpu.vector_store %arg2[%c0_1, %c0_2], %3 {strides = array<i32>} : memref<16x128xf32, #tpu.memory_space<vmem>>, vector<16x128xf32>,
    return
  }
  func.func @transform_0(%arg0: i32) -> (i32, i32) {
    %c0_i32 = arith.constant 0 : i32
    %c0_i32_0 = arith.constant 0 : i32
    return %arg0, %c0_i32 : i32, i32
  }
  func.func @transform_1(%arg0: i32) -> (i32, i32) {
    %c0_i32 = arith.constant 0 : i32
    %c0_i32_0 = arith.constant 0 : i32
    return %arg0, %c0_i32 : i32, i32
  }
}

</mosaic_0001>

<bundles_post_ra>
// kernel: tpu_custom_call.1
= control target key start
LH: loop header
LB: loop body
LE: loop exit
PB: predicated region body
PF: predicated region fallthrough
CT: control target
= control target key end

     0   :  { %6 = vsyncpa [#allocation3], 0  ;;  %s116_s0 = inlined_call_operand.hbm [shape: f32[16,128], index: 0, kind: input, shape index: {}]   ;;  %s117_s1 = inlined_call_operand.hbm [shape: f32[16,128], index: 1, kind: output, shape index: {}]  }
   0x1   :  { %7 = vsyncpa [#allocation4], 0  ;;  %s96_s6 = smov [#allocation2]  }
   0x2   :  { %s13_s7 = sshll.u32 %s96_s6, 4  ;;  %s14_s7 = int_to_ptr.vmem [resolvable:$true] %s13_s7 }
   0x3   :  { %s60_s8 = scalar_lea.vmem %s14_s7, 256  ;;  %p65_p1 = scmp.lt.s32.totalorder %s14_s7, %s14_s7 }
   0x4   :  { %p61_p0 = scmp.ne.s32.totalorder %s14_s7, %s60_s8  ;;  %p66_p2 = scmp.lt.s32.totalorder %s60_s8, %s60_s8 }
   0x6   :  { %p67_p3 = por %p66_p2, %p65_p1 }
   0x8   :  { %p68_p4 = pnand %p67_p3, %p61_p0 }
   0xa   :  { %71 = shalt.err (!%p68_p4)
}
   0xb   :  { %s97_s9 = smov 128   ;;  %s98_s10 = smov 8  }
   0xc   :  { %19 = dma.hbm_to_vmem [thread:$0]  %s116_s0, 256, %s14_s7, [#allocation3], %s97_s9, %s97_s9, %s98_s10  }
   0xd   :  { %92 = dma.done.wait [#allocation3], 256  }
   0xe   :  { %93 = vsyncadd [#allocation3], 4294967040  ;;  %v23_v0 = vld [vmem:[#allocation2] sm:$0xff]  ;;  %v24_v1 = vld [vmem:[#allocation2 + $0x8] sm:$0xff]  ;;  %s99_s13 = smov [#allocation5]  }
   0xf   :  { %s36_s14 = sshll.u32 %s99_s13, 4  ;;  %v25_v2 = vmul.f32 %v23_v0, %v23_v0  ;;  %v26_v3 = vmul.f32 %v24_v1, %v24_v1  ;;  %s37_s14 = int_to_ptr.vmem [resolvable:$true] %s36_s14 }
  0x10   :  { %s72_s15 = scalar_lea.vmem %s37_s14, 256  ;;  %p77_p6 = scmp.lt.s32.totalorder %s37_s14, %s37_s14 }
  0x11   :  { %v27_v4 = vmul.f32 0.5, %v25_v2  ;;  %v28_v5 = vmul.f32 0.5, %v26_v3  ;;  %p73_p5 = scmp.ne.s32.totalorder %s37_s14, %s72_s15  ;;  %p78_p7 = scmp.lt.s32.totalorder %s72_s15, %s72_s15 }
  0x13   :  { %29 = vst [vmem:[#allocation5] sm:$0xff] %v27_v4  ;;  %30 = vst [vmem:[#allocation5 + $0x8] sm:$0xff] %v28_v5  ;;  %p79_p8 = por %p78_p7, %p77_p6 }
  0x15   :  { %p80_p9 = pnand %p79_p8, %p73_p5 }
  0x17   :  { %83 = shalt.err (!%p80_p9)
}
  0x18   :  { %42 = dma.vmem_to_hbm [thread:$0]  %s37_s14, 256, %s117_s1, [#allocation4], %s97_s9, %s97_s9, %s98_s10  }
  0x19   :  { %94 = dma.done.wait [#allocation4], 256  }
  0x1a   :  { %95 = vsyncadd [#allocation4], 4294967040 }
  0x1b   :  { %46 = vsyncpa [#allocation3], 1 }
  0x1c   :  { %47 = vsyncpa [#allocation4], 1 }

</bundles_post_ra>
